<compile_context>
chip_gen: v6e
topology: v6e:2x2x1
jax: 0.10.0
libtpu: 0.0.40
codegen_flags: <defaults>
</compile_context>

<pallas_src>
import numpy as np
import jax
import jax.numpy as jnp
from jax.experimental import pallas as pl
from jax.experimental.pallas import tpu as pltpu

# ---- small shapes consistent with SimpleViT's FeedForward usage ----
B = 2        # batch
N = 8        # tokens per batch element
C = 32       # in_channels  (model width)
H = 64       # hid_channels (MLP width)
EPS = 1e-5   # nn.LayerNorm default eps
SQRT2 = float(np.sqrt(2.0))
LANE = 128
TILE_ROWS = 512   # row tile used once the token slab exceeds one tile


# ----------------------------- kernel --------------------------------------
def _ff_kernel(x_ref, w1_ref, w2_ref, bvec_ref, o_ref):
    hid = w1_ref.shape[1]
    cin = w2_ref.shape[1]

    x = x_ref[...]                                    # (rows, C) f32 in VMEM
    # --- LayerNorm statistics only (affine already folded into W1/b1) ---
    mu = jnp.mean(x, axis=-1, keepdims=True)
    var = jnp.mean((x - mu) * (x - mu), axis=-1, keepdims=True)
    xn = (x - mu) * jax.lax.rsqrt(var + EPS)

    bv = bvec_ref[...]                                # (1, 128) packed biases
    b1 = bv[:, :hid]
    b2 = bv[:, hid:hid + cin]

    # --- Linear 1 (f32 operands, f32 accumulation) ---
    h = jnp.dot(xn, w1_ref[...], preferred_element_type=jnp.float32) + b1
    # --- exact GELU (erf), matching nn.GELU() default (approximate='none') ---
    h = 0.5 * h * (1.0 + jax.lax.erf(h * (1.0 / SQRT2)))
    # --- Linear 2 ---
    o_ref[...] = jnp.dot(h, w2_ref[...], preferred_element_type=jnp.float32) + b2


# ----------------------------- wrapper --------------------------------------
def feedforward_pallas(x, prepped, tile_rows=TILE_ROWS):
    Bn, Nt, Ci = x.shape
    R = Bn * Nt
    xf = x.reshape(R, Ci)
    w1, w2, bvec = prepped['w1_eff'], prepped['w2'], prepped['b_packed']
    Hh = w1.shape[1]

    if R <= tile_rows:
        # Whole slab + weights (~tens of KiB) resident in VMEM; one dispatch,
        # no grid, no intermediate HBM traffic.
        out = pl.pallas_call(
            _ff_kernel,
            out_shape=jax.ShapeDtypeStruct((R, Ci), jnp.float32),
        )(xf, w1, w2, bvec)
        return out.reshape(Bn, Nt, Ci)

    # Large token slab: row-tiled grid, shardable across v7x's 2 TensorCores.
    n_tiles = pl.cdiv(R, tile_rows)
    Rp = n_tiles * tile_rows
    if Rp != R:
        xf = jnp.pad(xf, ((0, Rp - R), (0, 0)))   # padded rows are harmless
    out = pl.pallas_call(
        _ff_kernel,
        out_shape=jax.ShapeDtypeStruct((Rp, Ci), jnp.float32),
        grid_spec=pltpu.PrefetchScalarGridSpec(
            num_scalar_prefetch=0,
            grid=(n_tiles,),
            in_specs=[
                pl.BlockSpec((tile_rows, Ci), lambda i: (i, 0)),
                pl.BlockSpec((Ci, Hh), lambda i: (0, 0)),
                pl.BlockSpec((Hh, Ci), lambda i: (0, 0)),
                pl.BlockSpec((1, LANE), lambda i: (0, 0)),
            ],
            out_specs=pl.BlockSpec((tile_rows, Ci), lambda i: (i, 0)),
        ),
        compiler_params=pltpu.CompilerParams(
            dimension_semantics=("parallel",)),
    )(xf, w1, w2, bvec)
    return out[:R].reshape(Bn, Nt, Ci)


# ------------------------ deterministic params ------------------------------
def init_params(key):
    keys = iter(jax.random.split(key, 8))

    def nrm(shape, scale=0.08):
        return scale * jax.random.normal(next(keys), shape, jnp.float32)

    return {
        'ln_g': 1.0 + 0.1 * jax.random.normal(next(keys), (C,), jnp.float32),
        'ln_b': 0.1 * jax.random.normal(next(keys), (C,), jnp.float32),
        'w1': nrm((C, H)),
        'b1': nrm((H,)),
        'w2': nrm((H, C)),
        'b2': nrm((C,)),
    }


def prepare_params(raw):
    """One-time (init-time) folding + packing; nothing per-call."""
    g, beta = raw['ln_g'], raw['ln_b']
    w1, b1 = raw['w1'], raw['b1']
    w2, b2 = raw['w2'], raw['b2']
    # Fold LayerNorm affine into the first Linear.
    w1_eff = w1 * g[:, None]                    # (C, H)
    b1_eff = b1 + beta @ w1                     # (H,)
    # Pack all bias vectors into one lane-dense (1, 128) array.
    pad = LANE - (H + C)
    b_packed = jnp.concatenate(
        [b1_eff, b2, jnp.zeros((pad,), jnp.float32)])[None, :]
    return {
        'w1_eff': jnp.asarray(w1_eff, jnp.float32),
        'w2': jnp.asarray(w2, jnp.float32),
        'b_packed': jnp.asarray(b_packed, jnp.float32),
    }


# --------------------------- pure-JAX reference ------------------------------
def reference_forward(x, raw):
    mu = x.mean(-1, keepdims=True)
    var = ((x - mu) ** 2).mean(-1, keepdims=True)
    xn = (x - mu) * jax.lax.rsqrt(var + EPS) * raw['ln_g'] + raw['ln_b']
    h = xn @ raw['w1'] + raw['b1']
    h = 0.5 * h * (1.0 + jax.lax.erf(h / SQRT2))
    return h @ raw['w2'] + raw['b2']


# ----------------------------------- main ------------------------------------
if __name__ == "__main__":
    key = jax.random.PRNGKey(0)
    kx, kp, kx2 = jax.random.split(key, 3)
    raw = init_params(kp)
    prepped = prepare_params(raw)

    # --- small slab: single-block no-grid path ---
    x = jax.random.normal(kx, (B, N, C), jnp.float32)
    out = jax.block_until_ready(feedforward_pallas(x, prepped))
    ref = jax.block_until_ready(reference_forward(x, raw))
    assert out.shape == (B, N, C)
    assert np.all(np.isfinite(np.asarray(out)))
    if not np.allclose(np.asarray(out), np.asarray(ref), rtol=1e-4, atol=1e-4):
        raise AssertionError(
            "small-slab mismatch vs reference, max|diff|="
            f"{np.max(np.abs(np.asarray(out) - np.asarray(ref)))}")

    # --- larger slab: row-tiled 'parallel' grid path ---
    B2, N2 = 8, 256                          # 2048 tokens -> grid of 4 tiles
    x2 = jax.random.normal(kx2, (B2, N2, C), jnp.float32)
    out2 = jax.block_until_ready(feedforward_pallas(x2, prepped))
    ref2 = jax.block_until_ready(reference_forward(x2, raw))
    assert out2.shape == (B2, N2, C)
    assert np.all(np.isfinite(np.asarray(out2)))
    if not np.allclose(np.asarray(out2), np.asarray(ref2), rtol=1e-4, atol=1e-4):
        raise AssertionError(
            "tiled-slab mismatch vs reference, max|diff|="
            f"{np.max(np.abs(np.asarray(out2) - np.asarray(ref2)))}")

    print("KERNEL_OK")
</pallas_src>

<mosaic_0001>
module attributes {stable_mosaic.version = 11 : i64} {
  func.func @_ff_kernel(%arg0: memref<16x32xf32, #tpu.memory_space<vmem>>, %arg1: memref<32x64xf32, #tpu.memory_space<vmem>>, %arg2: memref<64x32xf32, #tpu.memory_space<vmem>>, %arg3: memref<1x128xf32, #tpu.memory_space<vmem>>, %arg4: memref<16x32xf32, #tpu.memory_space<vmem>>) attributes {dimension_semantics = [], scalar_prefetch = 0 : i64, scratch_operands = 0 : i64, tpu.core_type = #tpu.core_type<tc>} {
    %c0 = arith.constant 0 : index
    %c0_0 = arith.constant 0 : index
    %0 = vector.load %arg0[%c0, %c0_0] : memref<16x32xf32, #tpu.memory_space<vmem>>, vector<16x32xf32>
    %cst = arith.constant dense<0.000000e+00> : vector<16xf32>
    %1 = vector.multi_reduction <add>, %0, %cst [1] : vector<16x32xf32> to vector<16xf32>
    %2 = vector.shape_cast %1 : vector<16xf32> to vector<16x1xf32>
    %cst_1 = arith.constant 3.200000e+01 : f32
    %3 = vector.broadcast %cst_1 : f32 to vector<16x1xf32>
    %4 = arith.divf %2, %3 : vector<16x1xf32>
    %5 = vector.broadcast %4 : vector<16x1xf32> to vector<16x32xf32>
    %6 = arith.subf %0, %5 : vector<16x32xf32>
    %7 = vector.broadcast %4 : vector<16x1xf32> to vector<16x32xf32>
    %8 = arith.subf %0, %7 : vector<16x32xf32>
    %9 = arith.mulf %6, %8 : vector<16x32xf32>
    %cst_2 = arith.constant dense<0.000000e+00> : vector<16xf32>
    %10 = vector.multi_reduction <add>, %9, %cst_2 [1] : vector<16x32xf32> to vector<16xf32>
    %11 = vector.shape_cast %10 : vector<16xf32> to vector<16x1xf32>
    %cst_3 = arith.constant 3.200000e+01 : f32
    %12 = vector.broadcast %cst_3 : f32 to vector<16x1xf32>
    %13 = arith.divf %11, %12 : vector<16x1xf32>
    %14 = vector.broadcast %4 : vector<16x1xf32> to vector<16x32xf32>
    %15 = arith.subf %0, %14 : vector<16x32xf32>
    %cst_4 = arith.constant 9.99999974E-6 : f32
    %16 = vector.broadcast %cst_4 : f32 to vector<16x1xf32>
    %17 = arith.addf %13, %16 : vector<16x1xf32>
    %18 = math.rsqrt %17 : vector<16x1xf32>
    %19 = vector.broadcast %18 : vector<16x1xf32> to vector<16x32xf32>
    %20 = arith.mulf %15, %19 : vector<16x32xf32>
    %c0_5 = arith.constant 0 : index
    %c0_6 = arith.constant 0 : index
    %21 = vector.load %arg3[%c0_5, %c0_6] : memref<1x128xf32, #tpu.memory_space<vmem>>, vector<1x128xf32>
    %22 = vector.extract_strided_slice %21 {offsets = [0, 0], sizes = [1, 64], strides = [1, 1]} : vector<1x128xf32> to vector<1x64xf32>
    %23 = vector.extract_strided_slice %21 {offsets = [0, 64], sizes = [1, 32], strides = [1, 1]} : vector<1x128xf32> to vector<1x32xf32>
    %c0_7 = arith.constant 0 : index
    %c0_8 = arith.constant 0 : index
    %24 = vector.load %arg1[%c0_7, %c0_8] : memref<32x64xf32, #tpu.memory_space<vmem>>, vector<32x64xf32>
    %cst_9 = arith.constant dense<0.000000e+00> : vector<16x64xf32>
    %25 = tpu.matmul %20, %24, %cst_9 {dimension_numbers = #tpu.dot_dimension_numbers<[1], [0], [0], [1], [0, 0, 1, 1], [], []>} : vector<16x32xf32>, vector<32x64xf32>, vector<16x64xf32> -> vector<16x64xf32>
    %26 = vector.broadcast %22 : vector<1x64xf32> to vector<16x64xf32>
    %27 = arith.addf %25, %26 : vector<16x64xf32>
    %cst_10 = arith.constant 5.000000e-01 : f32
    %28 = vector.broadcast %cst_10 : f32 to vector<16x64xf32>
    %29 = arith.mulf %28, %27 : vector<16x64xf32>
    %cst_11 = arith.constant 0.707106769 : f32
    %30 = vector.broadcast %cst_11 : f32 to vector<16x64xf32>
    %31 = arith.mulf %27, %30 : vector<16x64xf32>
    %32 = math.erf %31 : vector<16x64xf32>
    %cst_12 = arith.constant 1.000000e+00 : f32
    %33 = vector.broadcast %cst_12 : f32 to vector<16x64xf32>
    %34 = arith.addf %33, %32 : vector<16x64xf32>
    %35 = arith.mulf %29, %34 : vector<16x64xf32>
    %c0_13 = arith.constant 0 : index
    %c0_14 = arith.constant 0 : index
    %36 = vector.load %arg2[%c0_13, %c0_14] : memref<64x32xf32, #tpu.memory_space<vmem>>, vector<64x32xf32>
    %cst_15 = arith.constant dense<0.000000e+00> : vector<16x32xf32>
    %37 = tpu.matmul %35, %36, %cst_15 {dimension_numbers = #tpu.dot_dimension_numbers<[1], [0], [0], [1], [0, 0, 1, 1], [], []>} : vector<16x64xf32>, vector<64x32xf32>, vector<16x32xf32> -> vector<16x32xf32>
    %38 = vector.broadcast %23 : vector<1x32xf32> to vector<16x32xf32>
    %39 = arith.addf %37, %38 : vector<16x32xf32>
    %c0_16 = arith.constant 0 : index
    %c0_17 = arith.constant 0 : index
    %40 = vector.load %arg4[%c0_16, %c0_17] : memref<16x32xf32, #tpu.memory_space<vmem>>, vector<16x32xf32>
    tpu.vector_store %arg4[%c0_16, %c0_17], %39 {strides = array<i32>} : memref<16x32xf32, #tpu.memory_space<vmem>>, vector<16x32xf32>,
    return
  }
}

</mosaic_0001>

<bundles_post_ra>
// kernel: tpu_custom_call.1
= control target key start
LH: loop header
LB: loop body
LE: loop exit
PB: predicated region body
PF: predicated region fallthrough
CT: control target
= control target key end

     0   :  { %vm20_vm0 = vcmask 261120   ;;  %s431_s0 = inlined_call_operand.vmem [shape: f32[16,32], index: 0, kind: input, shape index: {}]   ;;  %s432_s1 = inlined_call_operand.vmem [shape: f32[32,64], index: 1, kind: input, shape index: {}]   ;;  %s433_s2 = inlined_call_operand.vmem [shape: f32[64,32], index: 2, kind: input, shape index: {}]   ;;  %s434_s3 = inlined_call_operand.vmem [shape: f32[1,128], index: 3, kind: input, shape index: {}]   ;;  %s435_s4 = inlined_call_operand.hbm [shape: f32[16,32], index: 4, kind: output, shape index: {}]  }
   0x1   :  { %v18_v0 = vld [vmem:[%s431_s0] sm:$0xff]  ;;  %v19_v1 = vld [vmem:[%s431_s0 + $0x8] sm:$0xff] }
   0x2   :  { %9 = vsyncpa [#allocation3], 0  ;;  %v21_v2 = vsel %vm20_vm0, %v18_v0, 0.0  ;;  %v24_v3 = vsel %vm20_vm0, %v19_v1, 0.0  ;;  %v52_v14 = vld [vmem:[%s432_s1 + $0x18] sm:$0xff]  ;;  %v51_v15 = vld [vmem:[%s432_s1 + $0x10] sm:$0xff] }
   0x3   :  { %22 = vadd.xlane.f32.xlu0 %v21_v2  ;;  %282 = vmatprep.subr.mxu0 %v52_v14  ;;  %v50_v16 = vld [vmem:[%s432_s1 + $0x8] sm:$0xff]  ;;  %v49_v17 = vld [vmem:[%s432_s1] sm:$0xff]  ;;  %v157_v28 = vld [vmem:[%s433_s2 + $0x38] sm:$0xff]  ;;  %s346_s17 = smov 64   ;;  %vm161_vm1 = vcmask 523264  }
   0x4   :  { %283 = vmatpush3.msra.mxu0 %v52_v14  ;;  %293 = vmatprep.subr.mxu1 %v157_v28  ;;  %v156_v29 = vld [vmem:[%s433_s2 + $0x30] sm:$0xff]  ;;  %v155_v30 = vld [vmem:[%s433_s2 + $0x28] sm:$0xff]  ;;  %v154_v31 = vld [vmem:[%s433_s2 + $0x20] sm:$0xff] }
   0x5   :  { %284 = vmatprep.subr.mxu0 %v51_v15  ;;  %294 = vmatpush3.msra.mxu1 %v157_v28  ;;  %v153_v32 = vld [vmem:[%s433_s2 + $0x18] sm:$0xff]  ;;  %v152_v33 = vld [vmem:[%s433_s2 + $0x10] sm:$0xff]  ;;  %v151_v34 = vld [vmem:[%s433_s2 + $0x8] sm:$0xff] }
   0x6   :  { %285 = vmatpush3.msra.mxu0 %v51_v15  ;;  %295 = vmatprep.subr.mxu1 %v156_v29  ;;  %v150_v35 = vld [vmem:[%s433_s2] sm:$0xff]  ;;  %s347_s2 = smov [#allocation2]  }
   0x7   :  { %25 = vadd.xlane.f32.xlu0 %v24_v3  ;;  %286 = vmatprep.subr.mxu0 %v50_v16  ;;  %v261_v36 = vld [vmem:[%s434_s3] ss:$0 sm:$0xff]  ;;  %s250_s3 = sshll.u32 %s347_s2, 4  ;;  %s251_s3 = int_to_ptr.vmem [resolvable:$true] %s250_s3 }
   0x8   :  { %287 = vmatpush3.msra.mxu0 %v50_v16  ;;  %296 = vmatpush3.msra.mxu1 %v156_v29  ;;  %s324_s18 = scalar_lea.vmem %s251_s3, 256  ;;  %p329_p1 = scmp.lt.s32.totalorder %s251_s3, %s251_s3 }
   0x9   :  { %288 = vmatprep.subr.mxu0 %v49_v17  ;;  %297 = vmatprep.subr.mxu1 %v155_v30  ;;  %p325_p0 = scmp.ne.s32.totalorder %s251_s3, %s324_s18  ;;  %p330_p2 = scmp.lt.s32.totalorder %s324_s18, %s324_s18 }
   0xa   :  { %289 = vmatpush3.msra.mxu0 %v49_v17  ;;  %298 = vmatpush3.msra.mxu1 %v155_v30 }
   0xb   :  { %299 = vmatprep.subr.mxu1 %v154_v31  ;;  %p331_p3 = por %p330_p2, %p329_p1 }
   0xc   :  { %300 = vmatpush3.msra.mxu1 %v154_v31 }
   0xd   :  { %301 = vmatprep.subr.mxu1 %v153_v32  ;;  %p332_p4 = pnand %p331_p3, %p325_p0 }
   0xe   :  { %302 = vmatpush3.msra.mxu1 %v153_v32 }
   0xf   :  { %303 = vmatprep.subr.mxu1 %v152_v33 }
  0x10   :  { %304 = vmatpush3.msra.mxu1 %v152_v33 }
  0x11   :  { %305 = vmatprep.subr.mxu1 %v151_v34 }
  0x12   :  { %306 = vmatpush3.msra.mxu1 %v151_v34 }
  0x13   :  { %307 = vmatprep.subr.mxu1 %v150_v35 }
  0x14   :  { %308 = vmatpush3.msra.mxu1 %v150_v35 }
  0x1d   :  { %158 = vrot.lane.b32.xlu0 %v261_v36, %s346_s17 }
  0x8c   :  { %v23_v4 = vpop.xlane.xlu0 %22 }
  0x8d   :  { %v28_v5 = vmul.f32 0.03125, %v23_v4 }
  0x8f   :  { %v30_v6 = vsub.f32 %v18_v0, %v28_v5 }
  0x90   :  { %v26_v7 = vpop.xlane.xlu0 %25 }
  0x91   :  { %v29_v8 = vmul.f32 0.03125, %v26_v7  ;;  %v32_v9 = vmul.f32 %v30_v6, %v30_v6 }
  0x93   :  { %v31_v10 = vsub.f32 %v19_v1, %v29_v8  ;;  %v34_v11 = vsel %vm20_vm0, %v32_v9, 0.0 }
  0x94   :  { %35 = vadd.xlane.f32.xlu1 %v34_v11  ;;  %v159_v51 = vpop.permute.xlu0 %158 }
  0x95   :  { %v33_v12 = vmul.f32 %v31_v10, %v31_v10 }
  0x97   :  { %v37_v13 = vsel %vm20_vm0, %v33_v12, 0.0 }
  0x98   :  { %38 = vadd.xlane.f32.xlu1 %v37_v13 }
 0x11d   :  { %v36_v18 = vpop.xlane.xlu1 %35 }
 0x11e   :  { %v40_v19 = vmul.f32 0.03125, %v36_v18 }
 0x120   :  { %v42_v20 = vadd.f32 1e-05, %v40_v19 }
 0x121   :  { %v39_v21 = vpop.xlane.xlu1 %38 }
 0x122   :  { %316 = vrsqrt.f32 %v42_v20  ;;  %v41_v22 = vmul.f32 0.03125, %v39_v21 }
 0x124   :  { %v43_v23 = vadd.f32 1e-05, %v41_v22 }
 0x126   :  { %318 = vrsqrt.f32 %v43_v23 }
 0x12f   :  { %v317_v24 = vpop.eup %316 }
 0x130   :  { %v46_v25 = vmul.f32 %v317_v24, %v30_v6 }
 0x132   :  { %290 = vmatprep.mubr.msk.f32.mxu0 %vm20_vm0, %v46_v25 }
 0x133   :  { %v319_v26 = vpop.eup %318 }
 0x134   :  { %v47_v27 = vmul.f32 %v319_v26, %v31_v10 }
 0x136   :  { %291 = vmatmul.mubr.msk.f32.vlgmr.msra.gmra.mxu0 %vm20_vm0, %v47_v27 }
 0x1f6   :  { %v292_v37 = vpop.f32.mrf.mxu0 }
 0x1f7   :  { %v137_v38 = vadd.f32 %v292_v37, %v261_v36 }
 0x1f8   :  { %v131_v39 = vpop.f32.mrf.mxu0 }
 0x1f9   :  { %v143_v40 = vmul.f32 0.70710677, %v137_v38  ;;  %v132_v41 = vadd.f32 %v261_v36, %v131_v39  ;;  %v141_v48 = vmul.f32 0.5, %v137_v38 }
 0x1fb   :  { %320 = verf.f32 %v143_v40  ;;  %v142_v42 = vmul.f32 0.70710677, %v132_v41  ;;  %v140_v46 = vmul.f32 0.5, %v132_v41 }
 0x1fd   :  { %322 = verf.f32 %v142_v42 }
 0x208   :  { %v321_v43 = vpop.eup %320 }
 0x209   :  { %v147_v45 = vadd.f32 1.0, %v321_v43 }
 0x20a   :  { %v323_v44 = vpop.eup %322 }
 0x20b   :  { %v146_v47 = vadd.f32 1.0, %v323_v44  ;;  %v149_v50 = vmul.f32 %v147_v45, %v141_v48 }
 0x20d   :  { %v148_v49 = vmul.f32 %v146_v47, %v140_v46 }
 0x20f   :  { %309 = vmatprep.mubr.msk.f32.mxu1 %vm161_vm1, %v148_v49 }
 0x210   :  { %310 = vmatmul.mubr.msk.f32.vlgmr.msra.gmra.mxu1 %vm161_vm1, %v149_v50 }
 0x2d0   :  { %v311_v52 = vpop.f32.mrf.mxu1 }
 0x2d1   :  { %v240_v53 = vadd.f32 %v311_v52, %v159_v51 }
 0x2d2   :  { %v234_v54 = vpop.f32.mrf.mxu1 }
 0x2d3   :  { %244 = vst.msk [vmem:[#allocation2 + $0x8] sm:$0xff] %vm20_vm0, %v240_v53  ;;  %v235_v55 = vadd.f32 %v234_v54, %v159_v51 }
 0x2d5   :  { %243 = vst.msk [vmem:[#allocation2] sm:$0xff] %vm20_vm0, %v235_v55 }
 0x2d6   :  { %335 = shalt.err (!%p332_p4)
}
 0x2d7   :  { %s348_s0 = smov 128   ;;  %s349_s19 = smov 8  }
 0x2d8   :  { %256 = dma.vmem_to_hbm [thread:$0]  %s251_s3, 256, %s435_s4, [#allocation3], %s348_s0, %s348_s0, %s349_s19  }
 0x2d9   :  { %344 = dma.done.wait [#allocation3], 256  }
 0x2da   :  { %345 = vsyncadd [#allocation3], 4294967040 }
 0x2db   :  { %260 = vsyncpa [#allocation3], 1 }

</bundles_post_ra>
